<compile_context>
chip_gen: v6e
topology: v6e:2x2x1
jax: 0.10.0
libtpu: 0.0.40
codegen_flags: <defaults>
</compile_context>

<pallas_src>
import functools

import jax
import jax.numpy as jnp
from jax.experimental import pallas as pl
from jax.experimental.pallas import tpu as pltpu

_LANE = 128


def _cdiv(a, b):
    return -(-a // b)


def _round_up(a, b):
    return _cdiv(a, b) * b


def _quantile_loss_kernel(tau_ref, out_ref, label_ref, loss_ref, acc_ref, *,
                          delta: float, inv_count: float):
    # tau_ref   : (N, 1)   f32 quantile midpoints (constant block)
    # out_ref   : (N, TB)  predicted quantiles, batch on the lane axis
    # label_ref : (1, TB)  targets (sublane-broadcast in the subtract)
    # loss_ref  : (1, 128) per-split output row (scaled partial sum in lane 0)
    # acc_ref   : (1, 1)   f32 running partial sum (VMEM scratch)
    i = pl.program_id(1)

    @pl.when(i == 0)
    def _init():
        acc_ref[...] = jnp.zeros_like(acc_ref)

    q = out_ref[...].astype(jnp.float32)        # (N, TB)
    g = label_ref[...].astype(jnp.float32)      # (1, TB)
    tau = tau_ref[...]                          # (N, 1)

    d = g - q
    abs_d = jnp.abs(d)
    # F.huber_loss(out, label, reduction='none', delta=delta)
    h = jnp.where(abs_d < delta, 0.5 * d * d, delta * (abs_d - 0.5 * delta))
    # k = |tau - 1{d<0}|  ==  where(d<0, 1-tau, tau)  (single select, no cast/abs)
    k = jnp.where(d < 0.0, 1.0 - tau, tau)

    acc_ref[...] += jnp.sum(k * h)

    @pl.when(i == pl.num_programs(1) - 1)
    def _finalize():
        lane = jax.lax.broadcasted_iota(jnp.int32, loss_ref.shape, 1)
        loss_ref[...] = jnp.where(lane == 0, acc_ref[...] * inv_count, 0.0)


def quantile_loss(out: jax.Array, label: jax.Array, delta: float = 1.0, *,
                  max_lanes_per_tile: int | None = None) -> jax.Array:
    """Pallas TPU implementation of QuantileLoss.forward.

    out:   [B, N] predicted quantiles
    label: [B]    scalar targets
    returns: scalar float32 mean loss
    """
    b, n = out.shape
    itemsize = jnp.dtype(out.dtype).itemsize

    # ~2 MiB of `out` per tile (per pipeline buffer); lane-multiple.  Small
    # enough for v7x's 64 MiB VMEM even double-buffered, big enough to hide
    # the ~0.35 us per-step grid overhead.
    tb_max = max(_LANE, ((2 * 1024 * 1024) // max(n * itemsize, 1)) // _LANE * _LANE)
    if max_lanes_per_tile is not None:
        tb_max = max(_LANE, min(tb_max, _round_up(max_lanes_per_tile, _LANE)))
    tb_max = min(tb_max, 128 * 1024)

    b128 = _round_up(b, _LANE)
    raw_tiles = _cdiv(b128, tb_max)
    num_splits = 2 if raw_tiles >= 2 else 1          # 2 parallel streams on v7x
    total_tiles = _round_up(raw_tiles, num_splits)
    tb = _round_up(_cdiv(b128, total_tiles), _LANE)  # balanced, lane-multiple tiles
    b_pad = tb * total_tiles
    tiles_per_split = total_tiles // num_splits

    # Lane-dense layout: batch on the 128-lane axis.
    out_t = out.T                      # (N, B)
    lab = label.reshape(1, b)          # (1, B)

    pad = b_pad - b
    if pad:
        # zero padding => d = 0 => h = 0 => contributes nothing to the sum
        out_t = jnp.pad(out_t, ((0, 0), (0, pad)))
        lab = jnp.pad(lab, ((0, 0), (0, pad)))

    tau = ((jnp.arange(n, dtype=jnp.float32) + 0.5) / n).reshape(n, 1)

    kernel = functools.partial(_quantile_loss_kernel, delta=float(delta),
                               inv_count=1.0 / float(b * n))

    partials = pl.pallas_call(
        kernel,
        out_shape=jax.ShapeDtypeStruct((1, num_splits * _LANE), jnp.float32),
        grid_spec=pltpu.PrefetchScalarGridSpec(
            num_scalar_prefetch=0,
            grid=(num_splits, tiles_per_split),
            in_specs=[
                pl.BlockSpec((n, 1), lambda s, i: (0, 0)),
                pl.BlockSpec((n, tb), lambda s, i: (0, s * tiles_per_split + i)),
                pl.BlockSpec((1, tb), lambda s, i: (0, s * tiles_per_split + i)),
            ],
            out_specs=pl.BlockSpec((1, _LANE), lambda s, i: (0, s)),
            scratch_shapes=[pltpu.VMEM((1, 1), jnp.float32)],
        ),
        compiler_params=pltpu.CompilerParams(
            dimension_semantics=("parallel", "arbitrary"),
            vmem_limit_bytes=32 * 1024 * 1024,
        ),
    )(tau, out_t, lab)

    # Per-split scaled partial sums live in lane 0 of each 128-lane group,
    # everything else is zero -> a single tiny sum finishes the reduction.
    return jnp.sum(partials)


def _reference_quantile_loss(out, label, delta=1.0):
    # Pure-JAX reference mirroring the PyTorch module.
    b, n = out.shape
    lbl = jnp.broadcast_to(label.reshape(b, 1), (b, n)).astype(jnp.float32)
    q = out.astype(jnp.float32)
    tau = jnp.broadcast_to((jnp.arange(n, dtype=jnp.float32) + 0.5) / n, (b, n))
    d = lbl - q
    abs_d = jnp.abs(d)
    h = jnp.where(abs_d < delta, 0.5 * d * d, delta * (abs_d - 0.5 * delta))
    k = jnp.abs(tau - (d < 0.0).astype(jnp.float32))
    return jnp.mean(k * h)


if __name__ == "__main__":
    key = jax.random.PRNGKey(0)

    cases = [
        # (batch, n_quantiles, delta, max_lanes_per_tile override)
        dict(b=8, n=16, delta=1.0, max_lanes=None),     # tiny, single tile
        dict(b=300, n=51, delta=0.7, max_lanes=None),   # ragged B, N not 8-mult
        dict(b=520, n=16, delta=1.0, max_lanes=256),    # multi-tile, 2 splits
    ]

    for idx, c in enumerate(cases):
        k1, k2 = jax.random.split(jax.random.fold_in(key, idx))
        out = jax.random.normal(k1, (c["b"], c["n"]), dtype=jnp.float32)
        label = jax.random.normal(k2, (c["b"],), dtype=jnp.float32)

        loss = quantile_loss(out, label, delta=c["delta"],
                             max_lanes_per_tile=c["max_lanes"])
        loss = jax.block_until_ready(loss)

        ref = _reference_quantile_loss(out, label, delta=c["delta"])
        assert jnp.allclose(loss, ref, rtol=1e-5, atol=1e-5), (idx, loss, ref)

    print("KERNEL_OK")
</pallas_src>

<mosaic_0001>
module attributes {stable_mosaic.version = 11 : i64} {
  func.func @_quantile_loss_kernel(%arg0: i32, %arg1: i32, %arg2: memref<16x1xf32, #tpu.memory_space<vmem>>, %arg3: memref<16x128xf32, #tpu.memory_space<vmem>>, %arg4: memref<1x128xf32, #tpu.memory_space<vmem>>, %arg5: memref<1x128xf32, #tpu.memory_space<vmem>>, %arg6: memref<1x1xf32, #tpu.memory_space<vmem>>) attributes {dimension_semantics = [#tpu.dimension_semantics<parallel>, #tpu.dimension_semantics<arbitrary>], iteration_bounds = array<i64: 1, 1>, scalar_prefetch = 0 : i64, scratch_operands = 1 : i64, tpu.core_type = #tpu.core_type<tc>, window_params = [{pipeline_mode = #tpu.pipeline_mode<synchronous>, transform_indices = @transform_0, window_bounds = array<i64: 16, 1>}, {transform_indices = @transform_1, window_bounds = array<i64: 16, 128>}, {transform_indices = @transform_2, window_bounds = array<i64: 1, 128>}, {transform_indices = @transform_3, window_bounds = array<i64: 1, 128>}]} {
    %c0_i32 = arith.constant 0 : i32
    %0 = arith.cmpi eq, %arg1, %c0_i32 : i32
    %1 = arith.extui %0 : i1 to i32
    %c0_i32_0 = arith.constant 0 : i32
    %2 = arith.cmpi ne, %1, %c0_i32_0 : i32
    scf.if %2 {
      %cst_18 = arith.constant 0.000000e+00 : f32
      %40 = vector.broadcast %cst_18 : f32 to vector<1x1xf32>
      %c0_19 = arith.constant 0 : index
      %c0_20 = arith.constant 0 : index
      %41 = vector.load %arg6[%c0_19, %c0_20] : memref<1x1xf32, #tpu.memory_space<vmem>>, vector<1x1xf32>
      tpu.vector_store %arg6[%c0_19, %c0_20], %40 {strides = array<i32>} : memref<1x1xf32, #tpu.memory_space<vmem>>, vector<1x1xf32>,
    } else {
    }
    %c0 = arith.constant 0 : index
    %c0_1 = arith.constant 0 : index
    %3 = vector.load %arg3[%c0, %c0_1] : memref<16x128xf32, #tpu.memory_space<vmem>>, vector<16x128xf32>
    %c0_2 = arith.constant 0 : index
    %c0_3 = arith.constant 0 : index
    %4 = vector.load %arg4[%c0_2, %c0_3] : memref<1x128xf32, #tpu.memory_space<vmem>>, vector<1x128xf32>
    %c0_4 = arith.constant 0 : index
    %c0_5 = arith.constant 0 : index
    %5 = vector.load %arg2[%c0_4, %c0_5] : memref<16x1xf32, #tpu.memory_space<vmem>>, vector<16x1xf32>
    %6 = vector.broadcast %4 : vector<1x128xf32> to vector<16x128xf32>
    %7 = arith.subf %6, %3 : vector<16x128xf32>
    %8 = math.absf %7 : vector<16x128xf32>
    %cst = arith.constant 1.000000e+00 : f32
    %9 = vector.broadcast %cst : f32 to vector<16x128xf32>
    %10 = arith.cmpf olt, %8, %9 : vector<16x128xf32>
    %cst_6 = arith.constant 5.000000e-01 : f32
    %11 = vector.broadcast %cst_6 : f32 to vector<16x128xf32>
    %12 = arith.mulf %11, %7 : vector<16x128xf32>
    %13 = arith.mulf %12, %7 : vector<16x128xf32>
    %cst_7 = arith.constant 5.000000e-01 : f32
    %14 = vector.broadcast %cst_7 : f32 to vector<16x128xf32>
    %15 = arith.subf %8, %14 : vector<16x128xf32>
    %cst_8 = arith.constant 1.000000e+00 : f32
    %16 = vector.broadcast %cst_8 : f32 to vector<16x128xf32>
    %17 = arith.mulf %16, %15 : vector<16x128xf32>
    %18 = arith.select %10, %13, %17 : vector<16x128xi1>, vector<16x128xf32>
    %cst_9 = arith.constant 0.000000e+00 : f32
    %19 = vector.broadcast %cst_9 : f32 to vector<16x128xf32>
    %20 = arith.cmpf olt, %7, %19 : vector<16x128xf32>
    %cst_10 = arith.constant 1.000000e+00 : f32
    %21 = vector.broadcast %cst_10 : f32 to vector<16x1xf32>
    %22 = arith.subf %21, %5 : vector<16x1xf32>
    %23 = vector.shape_cast %22 : vector<16x1xf32> to vector<16x1xf32>
    %24 = vector.broadcast %23 : vector<16x1xf32> to vector<16x128xf32>
    %25 = vector.shape_cast %5 : vector<16x1xf32> to vector<16x1xf32>
    %26 = vector.broadcast %25 : vector<16x1xf32> to vector<16x128xf32>
    %27 = arith.select %20, %24, %26 : vector<16x128xi1>, vector<16x128xf32>
    %c0_11 = arith.constant 0 : index
    %c0_12 = arith.constant 0 : index
    %28 = vector.load %arg6[%c0_11, %c0_12] : memref<1x1xf32, #tpu.memory_space<vmem>>, vector<1x1xf32>
    %29 = arith.mulf %27, %18 : vector<16x128xf32>
    %30 = vector.shape_cast %29 : vector<16x128xf32> to vector<1x16x128xf32>
    %cst_13 = arith.constant dense<0.000000e+00> : vector<1xf32>
    %31 = vector.multi_reduction <add>, %30, %cst_13 [1, 2] : vector<1x16x128xf32> to vector<1xf32>
    %32 = vector.shape_cast %31 : vector<1xf32> to vector<1x1x1xf32>
    %33 = vector.extract %32[0, 0, 0] : f32 from vector<1x1x1xf32>
    %34 = vector.broadcast %33 : f32 to vector<1x1xf32>
    %35 = arith.addf %28, %34 : vector<1x1xf32>
    %c0_14 = arith.constant 0 : index
    %c0_15 = arith.constant 0 : index
    %36 = vector.load %arg6[%c0_14, %c0_15] : memref<1x1xf32, #tpu.memory_space<vmem>>, vector<1x1xf32>
    tpu.vector_store %arg6[%c0_14, %c0_15], %35 {strides = array<i32>} : memref<1x1xf32, #tpu.memory_space<vmem>>, vector<1x1xf32>,
    %c0_i32_16 = arith.constant 0 : i32
    %37 = arith.cmpi eq, %arg1, %c0_i32_16 : i32
    %38 = arith.extui %37 : i1 to i32
    %c0_i32_17 = arith.constant 0 : i32
    %39 = arith.cmpi ne, %38, %c0_i32_17 : i32
    scf.if %39 {
      %40 = tpu.iota {dimensions = array<i32: 1>} : vector<1x128xi32>
      %c0_i32_18 = arith.constant 0 : i32
      %41 = vector.broadcast %c0_i32_18 : i32 to vector<1x128xi32>
      %42 = arith.cmpi eq, %40, %41 : vector<1x128xi32>
      %c0_19 = arith.constant 0 : index
      %c0_20 = arith.constant 0 : index
      %43 = vector.load %arg6[%c0_19, %c0_20] : memref<1x1xf32, #tpu.memory_space<vmem>>, vector<1x1xf32>
      %cst_21 = arith.constant 7.812500e-03 : f32
      %44 = vector.broadcast %cst_21 : f32 to vector<1x1xf32>
      %45 = arith.mulf %43, %44 : vector<1x1xf32>
      %cst_22 = arith.constant 0.000000e+00 : f32
      %46 = vector.shape_cast %45 : vector<1x1xf32> to vector<1x1xf32>
      %47 = vector.broadcast %46 : vector<1x1xf32> to vector<1x128xf32>
      %48 = vector.broadcast %cst_22 : f32 to vector<1x128xf32>
      %49 = arith.select %42, %47, %48 : vector<1x128xi1>, vector<1x128xf32>
      %c0_23 = arith.constant 0 : index
      %c0_24 = arith.constant 0 : index
      %50 = vector.load %arg5[%c0_23, %c0_24] : memref<1x128xf32, #tpu.memory_space<vmem>>, vector<1x128xf32>
      tpu.vector_store %arg5[%c0_23, %c0_24], %49 {strides = array<i32>} : memref<1x128xf32, #tpu.memory_space<vmem>>, vector<1x128xf32>,
    } else {
    }
    return
  }
  func.func @transform_0(%arg0: i32, %arg1: i32) -> (i32, i32) {
    %c0_i32 = arith.constant 0 : i32
    %c0_i32_0 = arith.constant 0 : i32
    %c0_i32_1 = arith.constant 0 : i32
    return %c0_i32, %c0_i32_0 : i32, i32
  }
  func.func @transform_1(%arg0: i32, %arg1: i32) -> (i32, i32) {
    %c1_i32 = arith.constant 1 : i32
    %0 = arith.muli %arg0, %c1_i32 : i32
    %1 = arith.addi %0, %arg1 : i32
    %c0_i32 = arith.constant 0 : i32
    %c0_i32_0 = arith.constant 0 : i32
    return %c0_i32, %1 : i32, i32
  }
  func.func @transform_2(%arg0: i32, %arg1: i32) -> (i32, i32) {
    %c1_i32 = arith.constant 1 : i32
    %0 = arith.muli %arg0, %c1_i32 : i32
    %1 = arith.addi %0, %arg1 : i32
    %c0_i32 = arith.constant 0 : i32
    %c0_i32_0 = arith.constant 0 : i32
    return %c0_i32, %1 : i32, i32
  }
  func.func @transform_3(%arg0: i32, %arg1: i32) -> (i32, i32) {
    %c0_i32 = arith.constant 0 : i32
    %c0_i32_0 = arith.constant 0 : i32
    return %c0_i32, %arg0 : i32, i32
  }
}

</mosaic_0001>

<bundles_post_ra>
// kernel: tpu_custom_call.1
= control target key start
LH: loop header
LB: loop body
LE: loop exit
PB: predicated region body
PF: predicated region fallthrough
CT: control target
= control target key end

     0   :  { %v194_v2 = vmov 0   ;;  %s235_s0 = inlined_call_operand.vmem [shape: f32[16,1], index: 0, kind: input, shape index: {}]   ;;  %s236_s1 = inlined_call_operand.vmem [shape: f32[16,128], index: 1, kind: input, shape index: {}]   ;;  %s237_s2 = inlined_call_operand.vmem [shape: f32[1,128], index: 2, kind: input, shape index: {}]   ;;  %s238_s3 = inlined_call_operand.hbm [shape: f32[1,128], index: 3, kind: output, shape index: {}]  }
   0x1   :  { %v55_v0 = vld [vmem:[%s235_s0] sm:$0xff]  ;;  %v56_v1 = vld [vmem:[%s235_s0 + $0x8] sm:$0xff]  ;;  %171 = vset.pattern.permute.xlu1 %v194_v2  ;;  %170 = vset.pattern.permute.xlu0 %v194_v2 }
   0x2   :  { %v79_v3 = vsub.f32 1.0, %v55_v0  ;;  %93 = vperm.xlu1 %171, %v55_v0  }
   0x3   :  { %8 = vsyncpa [#allocation4], 0  ;;  %v80_v4 = vsub.f32 1.0, %v56_v1  ;;  %v52_v5 = vld [vmem:[%s236_s1] sm:$0xff]  ;;  %v53_v7 = vld [vmem:[%s236_s1 + $0x8] sm:$0xff]  ;;  %vm50_vm4 = vcmask 0   ;;  %v123_v42 = vlaneseq }
   0x4   :  { %83 = vperm.xlu0 %170, %v79_v3   ;;  %v162_v6 = vld [vmem:[%s237_s2] ss:$0 sm:$0xff]  ;;  %v195_v29 = vmov 0.0   ;;  %s196_s2 = smov [#allocation3]  }
   0x5   :  { %v63_v8 = vsub.f32 %v162_v6, %v52_v5  ;;  %v64_v9 = vsub.f32 %v162_v6, %v53_v7  ;;  %51 = vst.msk [vmem:[#allocation2] sm:$0x1] %vm50_vm4, %v195_v29  ;;  %v134_v43 = vshrl.u32 %v123_v42, 7  ;;  %v124_v44 = vand.u32 127, %v123_v42  ;;  %s145_s21 = sshll.u32 %s196_s2, 4  ;;  %s146_s21 = int_to_ptr.vmem [resolvable:$true] %s145_s21 }
   0x6   :  { %98 = vperm.xlu1 %171, %v56_v1   ;;  %s172_s22 = scalar_lea.vmem %s146_s21, 16  ;;  %s176_s23 = scalar_lea.vmem %s146_s21, 32 }
   0x7   :  { %v65_v10 = vand.u32 2147483647, %v63_v8  ;;  %v69_v11 = vmul.f32 0.5, %v63_v8  ;;  %v66_v12 = vand.u32 2147483647, %v64_v9  ;;  %v70_v13 = vmul.f32 0.5, %v64_v9  ;;  %p173_p0 = scmp.ne.s32.totalorder %s146_s21, %s172_s22  ;;  %p177_p1 = scmp.lt.s32.totalorder %s146_s21, %s146_s21 }
   0x8   :  { %88 = vperm.xlu0 %170, %v80_v4   ;;  %vm77_vm1 = vcmp.lt.f32.partialorder %v63_v8, 0.0  ;;  %vm78_vm3 = vcmp.lt.f32.partialorder %v64_v9, 0.0  ;;  %v135_v45 = vsub.s32 0, %v134_v43  ;;  %vm125_vm5 = vcmp.eq.s32.totalorder %v124_v44, 0  ;;  %p178_p2 = scmp.lt.s32.totalorder %s176_s23, %s172_s22 }
   0x9   :  { %v71_v15 = vmul.f32 %v69_v11, %v63_v8  ;;  %v163_v16 = vadd.f32 -0.5, %v65_v10  ;;  %v72_v17 = vmul.f32 %v70_v13, %v64_v9  ;;  %v164_v18 = vadd.f32 -0.5, %v66_v12 }
   0xa   :  { %vm67_vm0 = vcmp.lt.f32.partialorder %v65_v10, 1.0  ;;  %vm68_vm2 = vcmp.lt.f32.partialorder %v66_v12, 1.0  ;;  %p179_p3 = por %p178_p2, %p177_p1 }
   0xb   :  { %v75_v20 = vsel %vm67_vm0, %v71_v15, %v163_v16  ;;  %v76_v23 = vsel %vm68_vm2, %v72_v17, %v164_v18 }
   0xc   :  { %v103_v37 = vld [vmem:[#allocation2] sm:$0x1]  ;;  %p180_p4 = pnand %p179_p3, %p173_p0 }
  0x7d   :  { %v94_v14 = vpop.permute.xlu1 %93 }
  0x7f   :  { %v84_v19 = vpop.permute.xlu0 %83 }
  0x80   :  { %v101_v21 = vsel %vm77_vm1, %v84_v19, %v94_v14 }
  0x81   :  { %v99_v22 = vpop.permute.xlu1 %98  ;;  %v104_v26 = vmul.f32 %v101_v21, %v75_v20 }
  0x83   :  { %v89_v24 = vpop.permute.xlu0 %88 }
  0x84   :  { %v102_v25 = vsel %vm78_vm3, %v89_v24, %v99_v22 }
  0x85   :  { %v105_v27 = vmul.f32 %v102_v25, %v76_v23 }
  0x87   :  { %v106_v28 = vadd.f32 %v105_v27, %v104_v26 }
  0x89   :  { %107 = vadd.xlane.f32.xlu0 %v106_v28 }
 0x112   :  { %v108_v30 = vpop.xlane.xlu0 %107 }
 0x113   :  { %v109_v31 = vrot.slane %v108_v30, 4 }
 0x115   :  { %v110_v32 = vadd.f32 %v109_v31, %v108_v30 }
 0x117   :  { %v111_v33 = vrot.slane %v110_v32, 2 }
 0x119   :  { %v112_v34 = vadd.f32 %v111_v33, %v110_v32 }
 0x11b   :  { %v113_v35 = vrot.slane %v112_v34, 1 }
 0x11d   :  { %v114_v36 = vadd.f32 %v113_v35, %v112_v34 }
 0x11f   :  { %165 = vpush %v114_v36 }
 0x150   :  { %s166_s1 = spop %165 }
 0x151   :  { %v116_v38 = vstv %s166_s1 }
 0x152   :  { %v117_v39 = vadd.f32 %v116_v38, %v103_v37 }
 0x154   :  { %119 = vst.msk [vmem:[#allocation2] sm:$0x1] %vm50_vm4, %v117_v39 }
 0x15b   :  { %v126_v40 = vld [vmem:[#allocation2] sm:$0x1] }
 0x15c   :  { %v127_v41 = vmul.f32 0.0078125, %v126_v40 }
 0x15e   :  { %130 = vperm.xlu1 %171, %v127_v41  }
 0x1d9   :  { %v131_v46 = vpop.permute.xlu1 %130 }
 0x1da   :  { %v136_v47 = vrot.slane %v131_v46, %v135_v45 }
 0x1dc   :  { %v137_v48 = vsel %vm125_vm5, %v136_v47, 0.0 }
 0x1dd   :  { %138 = vst [vmem:[#allocation3] sm:$0x1] %v137_v48 }
 0x1de   :  { %183 = shalt.err (!%p180_p4)
}
 0x1df   :  { %148 = dma.vmem_to_hbm [thread:$0]  %s146_s21, 16, %s238_s3, [#allocation4]  }
 0x1e0   :  { %192 = dma.done.wait [#allocation4], 16  }
 0x1e1   :  { %193 = vsyncadd [#allocation4], 4294967280 }
 0x1e2   :  { %152 = vsyncpa [#allocation4], 1 }

</bundles_post_ra>
